<compile_context>
chip_gen: v7x
topology: tpu7x:2x2x1
jax: 0.10.0
libtpu: 0.0.40
codegen_flags: <defaults>
</compile_context>

<pallas_src>
import functools

import jax
import jax.numpy as jnp
from jax.experimental import pallas as pl
from jax.experimental.pallas import tpu as pltpu


def _depth_to_space_kernel(x_ref, o_ref, *, block_size, n_parts):
    """One grid step = one (batch n, channel-block c, row-tile t).

    x_ref : (1, b*b, c_blk, tile_h, W)   all b*b block phases of c_blk channels
    o_ref : (1, c_blk, tile_h, b*W*b)    last dim laid out as [i, w, j]; the wrapper's
                                         contiguous reshape turns it into rows h*b+i,
                                         cols w*b+j.  Written exactly once per step.
    """
    b = block_size
    c_blk, tile_h, W = x_ref.shape[2], x_ref.shape[3], x_ref.shape[4]
    Wb = W * b
    rows = c_blk * tile_h

    # One-hot column-scatter masks P_j[w, w*b + j] = 1, generated on the VPU from iota
    # comparisons (hoisted out of the i/j loops; zero HBM traffic, zero input buffers).
    src = jax.lax.broadcasted_iota(jnp.int32, (W, Wb), 0)        # source column w
    dst = jax.lax.broadcasted_iota(jnp.int32, (W, Wb), 1)        # target column w*b+j
    cols = [jnp.where(dst == src * b + j, 1.0, 0.0).astype(jnp.bfloat16)
            for j in range(b)]

    for i in range(b):                       # output row phase: rows h*b + i
        acc = None
        for j in range(b):                   # output col phase: cols w*b + j
            xk = x_ref[0, i * b + j]                               # (c_blk, tile_h, W)
            x32 = xk.reshape(rows, W).astype(jnp.float32)
            # Exact bf16 decomposition of the payload: x32 == sum(parts).  Each part is
            # exactly bf16 and the scatter operand is one-hot, so the single-pass bf16
            # MXU dots reproduce the f32 payload bit-exactly (3 passes == HIGH cost,
            # half of HIGHEST).
            parts, rem = [], x32
            for p_idx in range(n_parts):
                part = rem.astype(jnp.bfloat16)
                parts.append(part)
                if p_idx + 1 < n_parts:
                    rem = rem - part.astype(jnp.float32)
            d = None
            for part in parts:
                prod = jnp.dot(part, cols[j], preferred_element_type=jnp.float32)
                d = prod if d is None else d + prod                # (rows, W*b)
            # Different j hit disjoint output columns, so the sum is a pure scatter.
            acc = d if acc is None else acc + d
        o_ref[0, :, :, i * Wb:(i + 1) * Wb] = (
            acc.reshape(c_blk, tile_h, Wb).astype(o_ref.dtype))


def _estimate_vmem(b, c_blk, tile_h, W, itemsize):
    """Rough per-step VMEM footprint: pipeline buffers + kernel temporaries (bytes)."""
    blk = b * b * c_blk * tile_h * W * itemsize     # one input block == one output block
    pipeline = 2 * 2 * blk                          # in + out, double-buffered
    rows = c_blk * tile_h
    temps = rows * W * (4 + 4 + 3 * 2) + 2 * rows * W * b * 4   # f32 x/rem, bf16 parts, d/acc
    onehot = b * W * W * b * 2                      # b one-hot (W, W*b) bf16 masks
    return pipeline + temps + onehot


def _choose_tiling(B, s, H, W, b, itemsize, budget=24 * 1024 * 1024):
    """Pick (tile_h, c_blk) so the working set fits comfortably on v5e/v6e/v7x."""
    # Row tile: largest multiple-of-8 divisor of H, capped at 256 (whole H if none —
    # SN-GAN feature maps are small powers of two, so this path stays tiny).
    if H % 8 == 0:
        tile_h = max(t for t in range(8, min(H, 256) + 1, 8) if H % t == 0)
    else:
        tile_h = H
    while _estimate_vmem(b, 1, tile_h, W, itemsize) > budget and tile_h % 16 == 0:
        tile_h //= 2                                # very wide images: shrink row tile

    # Channel batch: amortise per-step overhead / fatten the MXU LHS, within budget.
    c_blk = 1
    if tile_h % 8 == 0:                             # keep in-kernel reshapes layout-clean
        cap = min(s, max(1, 2048 // max(1, tile_h)))
        for cand in range(cap, 0, -1):
            if s % cand == 0 and _estimate_vmem(b, cand, tile_h, W, itemsize) <= budget:
                c_blk = cand
                break

    # v7x has two TensorCores: make sure the (all-"parallel") grid has >= 2 steps
    # whenever the problem allows it.
    if B * (s // c_blk) * (H // tile_h) < 2:
        if c_blk % 2 == 0:
            c_blk //= 2
        elif tile_h % 16 == 0:
            tile_h //= 2
    return tile_h, c_blk


def depth_to_space(x_nchw, block_size):
    """Forward pass of DepthToSpace. x_nchw: (B, C, H, W) -> (B, C/b^2, H*b, W*b)."""
    B, C, H, W = x_nchw.shape
    b = int(block_size)
    assert C % (b * b) == 0, "channels must be divisible by block_size**2"
    s = C // (b * b)
    dtype = x_nchw.dtype
    itemsize = jnp.dtype(dtype).itemsize
    n_parts = 1 if dtype == jnp.bfloat16 else 3

    tile_h, c_blk = _choose_tiling(B, s, H, W, b, itemsize)
    n_t = H // tile_h
    n_c = s // c_blk

    # Free reshape: channel index (i*b + j)*s + c splits into (phase k = i*b+j, c).
    x_r = x_nchw.reshape(B, b * b, s, H, W)

    kernel = functools.partial(_depth_to_space_kernel, block_size=b, n_parts=n_parts)

    out_flat = pl.pallas_call(
        kernel,
        out_shape=jax.ShapeDtypeStruct((B, s, H, b * W * b), dtype),
        grid=(B, n_c, n_t),
        in_specs=[
            pl.BlockSpec((1, b * b, c_blk, tile_h, W),
                         lambda n, c, t: (n, 0, c, t, 0)),
        ],
        out_specs=pl.BlockSpec((1, c_blk, tile_h, b * W * b),
                               lambda n, c, t: (n, c, t, 0)),
        compiler_params=pltpu.CompilerParams(
            dimension_semantics=("parallel", "parallel", "parallel"),
            vmem_limit_bytes=48 * 1024 * 1024,
        ),
    )(x_r)

    # Free, contiguous reshape: last dim [i, w, j] folds into rows h*b+i, cols w*b+j.
    return out_flat.reshape(B, s, H * b, W * b)


def depth_to_space_ref(x, b):
    """Pure-JAX reference matching the PyTorch DepthToSpace trace."""
    B, C, H, W = x.shape
    s = C // (b * b)
    x6 = x.reshape(B, b, b, s, H, W)                      # channel -> (i, j, c)
    return jnp.transpose(x6, (0, 3, 4, 1, 5, 2)).reshape(B, s, H * b, W * b)


if __name__ == "__main__":
    B, C, H, W = 2, 4, 16, 16
    block_size = 2

    key = jax.random.PRNGKey(0)
    k0, k1 = jax.random.split(key)
    x = jax.random.normal(k0, (B, C, H, W), dtype=jnp.float32)

    out = jax.block_until_ready(depth_to_space(x, block_size))
    s_depth = C // (block_size * block_size)
    assert out.shape == (B, s_depth, H * block_size, W * block_size)

    ref = depth_to_space_ref(x, block_size)
    # Pure data movement via exact bf16-split one-hot scatters -> designed to be
    # bit-exact; the tolerance is ~10^4 tighter than the previous revision and would
    # catch any precision regression (DEFAULT bf16 dot errs ~1e-2, 3-pass HIGH ~1e-5).
    assert jnp.allclose(out, ref, atol=1e-6, rtol=1e-6), \
        float(jnp.max(jnp.abs(out - ref)))

    # Second config: s_depth > 1 (exercises the channel grid axis / c_blk logic).
    x2 = jax.random.normal(k1, (1, 8, 8, 8), dtype=jnp.float32)
    out2 = jax.block_until_ready(depth_to_space(x2, 2))
    ref2 = depth_to_space_ref(x2, 2)
    assert out2.shape == (1, 2, 16, 16)
    assert jnp.allclose(out2, ref2, atol=1e-6, rtol=1e-6), \
        float(jnp.max(jnp.abs(out2 - ref2)))

    print("KERNEL_OK")
</pallas_src>

<mosaic_0001>
module attributes {stable_mosaic.version = 11 : i64} {
  func.func @_depth_to_space_kernel(%arg0: i32, %arg1: i32, %arg2: i32, %arg3: memref<1x4x1x16x16xf32, #tpu.memory_space<vmem>>, %arg4: memref<1x1x16x64xf32, #tpu.memory_space<vmem>>) attributes {dimension_semantics = [#tpu.dimension_semantics<parallel>, #tpu.dimension_semantics<parallel>, #tpu.dimension_semantics<parallel>], iteration_bounds = array<i64: 2, 1, 1>, scalar_prefetch = 0 : i64, scratch_operands = 0 : i64, tpu.core_type = #tpu.core_type<tc>, window_params = [{transform_indices = @transform_0, window_bounds = array<i64: 1, 4, 1, 16, 16>}, {transform_indices = @transform_1, window_bounds = array<i64: 1, 1, 16, 64>}]} {
    %0 = tpu.iota {dimensions = array<i32: 0>} : vector<16x32xi32>
    %1 = tpu.iota {dimensions = array<i32: 1>} : vector<16x32xi32>
    %c2_i32 = arith.constant 2 : i32
    %2 = vector.broadcast %c2_i32 : i32 to vector<16x32xi32>
    %3 = arith.muli %0, %2 : vector<16x32xi32>
    %c0_i32 = arith.constant 0 : i32
    %4 = vector.broadcast %c0_i32 : i32 to vector<16x32xi32>
    %5 = arith.addi %3, %4 : vector<16x32xi32>
    %6 = arith.cmpi eq, %1, %5 : vector<16x32xi32>
    %cst = arith.constant 1.000000e+00 : f32
    %cst_0 = arith.constant 0.000000e+00 : f32
    %7 = vector.broadcast %cst : f32 to vector<16x32xf32>
    %8 = vector.broadcast %cst_0 : f32 to vector<16x32xf32>
    %9 = arith.select %6, %7, %8 : vector<16x32xi1>, vector<16x32xf32>
    %10 = arith.truncf %9 : vector<16x32xf32> to vector<16x32xbf16>
    %c2_i32_1 = arith.constant 2 : i32
    %11 = vector.broadcast %c2_i32_1 : i32 to vector<16x32xi32>
    %12 = arith.muli %0, %11 : vector<16x32xi32>
    %c1_i32 = arith.constant 1 : i32
    %13 = vector.broadcast %c1_i32 : i32 to vector<16x32xi32>
    %14 = arith.addi %12, %13 : vector<16x32xi32>
    %15 = arith.cmpi eq, %1, %14 : vector<16x32xi32>
    %cst_2 = arith.constant 1.000000e+00 : f32
    %cst_3 = arith.constant 0.000000e+00 : f32
    %16 = vector.broadcast %cst_2 : f32 to vector<16x32xf32>
    %17 = vector.broadcast %cst_3 : f32 to vector<16x32xf32>
    %18 = arith.select %15, %16, %17 : vector<16x32xi1>, vector<16x32xf32>
    %19 = arith.truncf %18 : vector<16x32xf32> to vector<16x32xbf16>
    %c0 = arith.constant 0 : index
    %c0_4 = arith.constant 0 : index
    %c0_5 = arith.constant 0 : index
    %c0_6 = arith.constant 0 : index
    %c0_7 = arith.constant 0 : index
    %20 = vector.load %arg3[%c0, %c0_4, %c0_5, %c0_6, %c0_7] : memref<1x4x1x16x16xf32, #tpu.memory_space<vmem>>, vector<1x1x1x16x16xf32>
    %21 = vector.shape_cast %20 : vector<1x1x1x16x16xf32> to vector<1x16x16xf32>
    %22 = vector.shape_cast %21 : vector<1x16x16xf32> to vector<16x16xf32>
    %23 = arith.truncf %22 : vector<16x16xf32> to vector<16x16xbf16>
    %24 = arith.extf %23 : vector<16x16xbf16> to vector<16x16xf32>
    %25 = arith.subf %22, %24 : vector<16x16xf32>
    %26 = arith.truncf %25 : vector<16x16xf32> to vector<16x16xbf16>
    %27 = arith.extf %26 : vector<16x16xbf16> to vector<16x16xf32>
    %28 = arith.subf %25, %27 : vector<16x16xf32>
    %29 = arith.truncf %28 : vector<16x16xf32> to vector<16x16xbf16>
    %cst_8 = arith.constant dense<0.000000e+00> : vector<16x32xf32>
    %30 = tpu.matmul %23, %10, %cst_8 {dimension_numbers = #tpu.dot_dimension_numbers<[1], [0], [0], [1], [0, 0, 1, 1], [], []>} : vector<16x16xbf16>, vector<16x32xbf16>, vector<16x32xf32> -> vector<16x32xf32>
    %cst_9 = arith.constant dense<0.000000e+00> : vector<16x32xf32>
    %31 = tpu.matmul %26, %10, %cst_9 {dimension_numbers = #tpu.dot_dimension_numbers<[1], [0], [0], [1], [0, 0, 1, 1], [], []>} : vector<16x16xbf16>, vector<16x32xbf16>, vector<16x32xf32> -> vector<16x32xf32>
    %32 = arith.addf %30, %31 : vector<16x32xf32>
    %cst_10 = arith.constant dense<0.000000e+00> : vector<16x32xf32>
    %33 = tpu.matmul %29, %10, %cst_10 {dimension_numbers = #tpu.dot_dimension_numbers<[1], [0], [0], [1], [0, 0, 1, 1], [], []>} : vector<16x16xbf16>, vector<16x32xbf16>, vector<16x32xf32> -> vector<16x32xf32>
    %34 = arith.addf %32, %33 : vector<16x32xf32>
    %c0_11 = arith.constant 0 : index
    %c1 = arith.constant 1 : index
    %c0_12 = arith.constant 0 : index
    %c0_13 = arith.constant 0 : index
    %c0_14 = arith.constant 0 : index
    %35 = vector.load %arg3[%c0_11, %c1, %c0_12, %c0_13, %c0_14] : memref<1x4x1x16x16xf32, #tpu.memory_space<vmem>>, vector<1x1x1x16x16xf32>
    %36 = vector.shape_cast %35 : vector<1x1x1x16x16xf32> to vector<1x16x16xf32>
    %37 = vector.shape_cast %36 : vector<1x16x16xf32> to vector<16x16xf32>
    %38 = arith.truncf %37 : vector<16x16xf32> to vector<16x16xbf16>
    %39 = arith.extf %38 : vector<16x16xbf16> to vector<16x16xf32>
    %40 = arith.subf %37, %39 : vector<16x16xf32>
    %41 = arith.truncf %40 : vector<16x16xf32> to vector<16x16xbf16>
    %42 = arith.extf %41 : vector<16x16xbf16> to vector<16x16xf32>
    %43 = arith.subf %40, %42 : vector<16x16xf32>
    %44 = arith.truncf %43 : vector<16x16xf32> to vector<16x16xbf16>
    %cst_15 = arith.constant dense<0.000000e+00> : vector<16x32xf32>
    %45 = tpu.matmul %38, %19, %cst_15 {dimension_numbers = #tpu.dot_dimension_numbers<[1], [0], [0], [1], [0, 0, 1, 1], [], []>} : vector<16x16xbf16>, vector<16x32xbf16>, vector<16x32xf32> -> vector<16x32xf32>
    %cst_16 = arith.constant dense<0.000000e+00> : vector<16x32xf32>
    %46 = tpu.matmul %41, %19, %cst_16 {dimension_numbers = #tpu.dot_dimension_numbers<[1], [0], [0], [1], [0, 0, 1, 1], [], []>} : vector<16x16xbf16>, vector<16x32xbf16>, vector<16x32xf32> -> vector<16x32xf32>
    %47 = arith.addf %45, %46 : vector<16x32xf32>
    %cst_17 = arith.constant dense<0.000000e+00> : vector<16x32xf32>
    %48 = tpu.matmul %44, %19, %cst_17 {dimension_numbers = #tpu.dot_dimension_numbers<[1], [0], [0], [1], [0, 0, 1, 1], [], []>} : vector<16x16xbf16>, vector<16x32xbf16>, vector<16x32xf32> -> vector<16x32xf32>
    %49 = arith.addf %47, %48 : vector<16x32xf32>
    %50 = arith.addf %34, %49 : vector<16x32xf32>
    %51 = vector.shape_cast %50 : vector<16x32xf32> to vector<1x16x32xf32>
    %c0_18 = arith.constant 0 : index
    %c0_19 = arith.constant 0 : index
    %c0_20 = arith.constant 0 : index
    %c0_21 = arith.constant 0 : index
    %52 = vector.load %arg4[%c0_18, %c0_19, %c0_20, %c0_21] : memref<1x1x16x64xf32, #tpu.memory_space<vmem>>, vector<1x1x16x32xf32>
    %53 = vector.shape_cast %52 : vector<1x1x16x32xf32> to vector<1x16x32xf32>
    %54 = vector.shape_cast %51 : vector<1x16x32xf32> to vector<1x1x16x32xf32>
    tpu.vector_store %arg4[%c0_18, %c0_19, %c0_20, %c0_21], %54 {strides = array<i32>} : memref<1x1x16x64xf32, #tpu.memory_space<vmem>>, vector<1x1x16x32xf32>,
    %c0_22 = arith.constant 0 : index
    %c2 = arith.constant 2 : index
    %c0_23 = arith.constant 0 : index
    %c0_24 = arith.constant 0 : index
    %c0_25 = arith.constant 0 : index
    %55 = vector.load %arg3[%c0_22, %c2, %c0_23, %c0_24, %c0_25] : memref<1x4x1x16x16xf32, #tpu.memory_space<vmem>>, vector<1x1x1x16x16xf32>
    %56 = vector.shape_cast %55 : vector<1x1x1x16x16xf32> to vector<1x16x16xf32>
    %57 = vector.shape_cast %56 : vector<1x16x16xf32> to vector<16x16xf32>
    %58 = arith.truncf %57 : vector<16x16xf32> to vector<16x16xbf16>
    %59 = arith.extf %58 : vector<16x16xbf16> to vector<16x16xf32>
    %60 = arith.subf %57, %59 : vector<16x16xf32>
    %61 = arith.truncf %60 : vector<16x16xf32> to vector<16x16xbf16>
    %62 = arith.extf %61 : vector<16x16xbf16> to vector<16x16xf32>
    %63 = arith.subf %60, %62 : vector<16x16xf32>
    %64 = arith.truncf %63 : vector<16x16xf32> to vector<16x16xbf16>
    %cst_26 = arith.constant dense<0.000000e+00> : vector<16x32xf32>
    %65 = tpu.matmul %58, %10, %cst_26 {dimension_numbers = #tpu.dot_dimension_numbers<[1], [0], [0], [1], [0, 0, 1, 1], [], []>} : vector<16x16xbf16>, vector<16x32xbf16>, vector<16x32xf32> -> vector<16x32xf32>
    %cst_27 = arith.constant dense<0.000000e+00> : vector<16x32xf32>
    %66 = tpu.matmul %61, %10, %cst_27 {dimension_numbers = #tpu.dot_dimension_numbers<[1], [0], [0], [1], [0, 0, 1, 1], [], []>} : vector<16x16xbf16>, vector<16x32xbf16>, vector<16x32xf32> -> vector<16x32xf32>
    %67 = arith.addf %65, %66 : vector<16x32xf32>
    %cst_28 = arith.constant dense<0.000000e+00> : vector<16x32xf32>
    %68 = tpu.matmul %64, %10, %cst_28 {dimension_numbers = #tpu.dot_dimension_numbers<[1], [0], [0], [1], [0, 0, 1, 1], [], []>} : vector<16x16xbf16>, vector<16x32xbf16>, vector<16x32xf32> -> vector<16x32xf32>
    %69 = arith.addf %67, %68 : vector<16x32xf32>
    %c0_29 = arith.constant 0 : index
    %c3 = arith.constant 3 : index
    %c0_30 = arith.constant 0 : index
    %c0_31 = arith.constant 0 : index
    %c0_32 = arith.constant 0 : index
    %70 = vector.load %arg3[%c0_29, %c3, %c0_30, %c0_31, %c0_32] : memref<1x4x1x16x16xf32, #tpu.memory_space<vmem>>, vector<1x1x1x16x16xf32>
    %71 = vector.shape_cast %70 : vector<1x1x1x16x16xf32> to vector<1x16x16xf32>
    %72 = vector.shape_cast %71 : vector<1x16x16xf32> to vector<16x16xf32>
    %73 = arith.truncf %72 : vector<16x16xf32> to vector<16x16xbf16>
    %74 = arith.extf %73 : vector<16x16xbf16> to vector<16x16xf32>
    %75 = arith.subf %72, %74 : vector<16x16xf32>
    %76 = arith.truncf %75 : vector<16x16xf32> to vector<16x16xbf16>
    %77 = arith.extf %76 : vector<16x16xbf16> to vector<16x16xf32>
    %78 = arith.subf %75, %77 : vector<16x16xf32>
    %79 = arith.truncf %78 : vector<16x16xf32> to vector<16x16xbf16>
    %cst_33 = arith.constant dense<0.000000e+00> : vector<16x32xf32>
    %80 = tpu.matmul %73, %19, %cst_33 {dimension_numbers = #tpu.dot_dimension_numbers<[1], [0], [0], [1], [0, 0, 1, 1], [], []>} : vector<16x16xbf16>, vector<16x32xbf16>, vector<16x32xf32> -> vector<16x32xf32>
    %cst_34 = arith.constant dense<0.000000e+00> : vector<16x32xf32>
    %81 = tpu.matmul %76, %19, %cst_34 {dimension_numbers = #tpu.dot_dimension_numbers<[1], [0], [0], [1], [0, 0, 1, 1], [], []>} : vector<16x16xbf16>, vector<16x32xbf16>, vector<16x32xf32> -> vector<16x32xf32>
    %82 = arith.addf %80, %81 : vector<16x32xf32>
    %cst_35 = arith.constant dense<0.000000e+00> : vector<16x32xf32>
    %83 = tpu.matmul %79, %19, %cst_35 {dimension_numbers = #tpu.dot_dimension_numbers<[1], [0], [0], [1], [0, 0, 1, 1], [], []>} : vector<16x16xbf16>, vector<16x32xbf16>, vector<16x32xf32> -> vector<16x32xf32>
    %84 = arith.addf %82, %83 : vector<16x32xf32>
    %85 = arith.addf %69, %84 : vector<16x32xf32>
    %86 = vector.shape_cast %85 : vector<16x32xf32> to vector<1x16x32xf32>
    %c0_36 = arith.constant 0 : index
    %c0_37 = arith.constant 0 : index
    %c0_38 = arith.constant 0 : index
    %c32 = arith.constant 32 : index
    %87 = vector.load %arg4[%c0_36, %c0_37, %c0_38, %c32] : memref<1x1x16x64xf32, #tpu.memory_space<vmem>>, vector<1x1x16x32xf32>
    %88 = vector.shape_cast %87 : vector<1x1x16x32xf32> to vector<1x16x32xf32>
    %89 = vector.shape_cast %86 : vector<1x16x32xf32> to vector<1x1x16x32xf32>
    tpu.vector_store %arg4[%c0_36, %c0_37, %c0_38, %c32], %89 {strides = array<i32>} : memref<1x1x16x64xf32, #tpu.memory_space<vmem>>, vector<1x1x16x32xf32>,
    return
  }
  func.func @transform_0(%arg0: i32, %arg1: i32, %arg2: i32) -> (i32, i32, i32, i32, i32) {
    %c0_i32 = arith.constant 0 : i32
    %c0_i32_0 = arith.constant 0 : i32
    %c0_i32_1 = arith.constant 0 : i32
    return %arg0, %c0_i32, %arg1, %arg2, %c0_i32_0 : i32, i32, i32, i32, i32
  }
  func.func @transform_1(%arg0: i32, %arg1: i32, %arg2: i32) -> (i32, i32, i32, i32) {
    %c0_i32 = arith.constant 0 : i32
    %c0_i32_0 = arith.constant 0 : i32
    return %arg0, %arg1, %arg2, %c0_i32 : i32, i32, i32, i32
  }
}

</mosaic_0001>

<bundles_post_ra>
// kernel: tpu_custom_call.1
= control target key start
LH: loop header
LB: loop body
LE: loop exit
PB: predicated region body
PF: predicated region fallthrough
CT: control target
= control target key end

     0   :  { %6 = vsyncpa [#allocation3], 0  ;;  %s1593_s0 = inlined_call_operand.hbm [shape: f32[2,4,1,16,16], index: 0, kind: input, shape index: {}]   ;;  %s1594_s1 = inlined_call_operand.hbm [shape: f32[2,1,16,64], index: 1, kind: output, shape index: {}]  }
   0x1   :  { %8 = vsyncpa [#allocation3 + $0x1], 0 }
   0x2   :  { %9 = vsyncpa [#allocation4], 0 }
   0x3   :  { %11 = vsyncpa [#allocation4 + $0x1], 0  ;;  %s1309_s6 = smov 0   ;;  %s1311_s7 = smov 0  }
   0x4   :  { %s1313_s8 = smov 0   ;;  %s1315_s9 = smov 0  }
   0x5   :  { %s1317_s10 = smov 0   ;;  %s1319_s11 = smov 0  }
   0x6 LB: > { %s910_s12 = sadd.s32 4294967295, %s1287_s11   ;;  %s911_s13 = sadd.s32 4294967294, %s1287_s11   ;;  %s1287_s11 = sphi %s1319_s11, %s17_s11   ;;  %s1283_s10 = sphi %s1317_s10, %s1613_s10   ;;  %s1279_s9 = sphi %s1315_s9, %s1612_s9   ;;  %s1275_s8 = sphi %s1313_s8, %s1611_s8   ;;  %s1271_s7 = sphi %s1311_s7, %s1610_s7   ;;  %s1267_s6 = sphi %s1309_s6, %s1609_s6  }
   0x7   : > { %s36_s14 = sadd.s32 1, %s1283_s10  ;;  %s47_s15 = sadd.s32 1, %s1275_s8 }
   0x8   : > { %p38_p0 = scmp.ge.s32.totalorder %s36_s14, 2  ;;  %p54_p1 = scmp.ne.s32.totalorder %s1275_s8, %s1271_s7 }
   0x9   : > { %p55_p2 = scmp.eq.s32.totalorder %s1287_s11, 0  ;;  %p60_p3 = scmp.ne.s32.totalorder %s1271_s7, %s1267_s6 }
   0xa   : > { %s1615_s14 = smov (%p38_p0, %s36_s14), 0  ;;  %p61_p5 = scmp.eq.s32.totalorder %s910_s12, 0 }
   0xb   : > { %p1350_p4 = por %p55_p2, %p54_p1  ;;  %s40_s17 = ssub.s32 %s1283_s10, %s1615_s14 }
   0xc   : > { %p88_p6 = scmp.eq.s32.totalorder %s910_s12, 1  ;;  %p45_p7 = scmp.eq.s32.totalorder %s40_s17, 0 }
   0xd   : > { %p1356_p8 = por %p61_p5, %p60_p3  ;;  %p94_p10 = scmp.eq.s32.totalorder %s911_s13, 1 }
   0xe   : > { %p1360_p9 = por %p88_p6, %p54_p1  ;;  %p1117_p13 = scmp.lt.s32.totalorder %s1287_s11, 2 }
   0xf   : > { %s1365_s20 = scalar_select %p45_p7, %s1275_s8, %s47_s15  }
  0x10   : > { %s1598_s19 = scalar_select %p1360_p9, 1, 0 }
  0x11   : > { %p1367_p11 = por %p94_p10, %p60_p3  ;;  %s114_s22 = sand.u32 1, %s1275_s8  }
  0x12   : > { %s914_s23 = sshll.u32 %s114_s22, 6  ;;  %s967_s24 = sshll.u32 %s1283_s10, 10 }
  0x13   : > { %s1599_s21 = scalar_select %p1367_p11, 1, 0 }
  0x14   : > { %s1378_s27 = scalar_lea.hbm %s1593_s0, %s967_s24  ;;  %s118_s28 = scalar_lea.vmem [#allocation2], %s914_s23 }
  0x15   : > { %s129_s29 = sshll.u32 %s118_s28, 4  ;;  %p1384_p0 = pnand %p1117_p13, %p1350_p4  ;;  %s1380_s29 = int_to_ptr.vmem [resolvable:$true] %s129_s29 }
  0x16   : > { %s1389_s2 = scalar_lea.sflag [#allocation3], %s114_s22  ;;  %s1175_s3 = scalar_lea.hbm %s1378_s27, 1024 }
  0x17   : > { %p1176_p2 = scmp.ne.s32.totalorder %s1378_s27, %s1175_s3  ;;  %p1177_p3 = pneg %p1384_p0 }
  0x18   : > { %s1180_s12 = scalar_lea.hbm %s1593_s0, 2048  ;;  %p1181_p4 = scmp.lt.u32.totalorder %s1378_s27, %s1593_s0 }
  0x19   : > { %p1178_p5 = pnand %p1177_p3, %p1176_p2  ;;  %p1182_p7 = scmp.lt.u32.totalorder %s1180_s12, %s1175_s3 }
  0x1a   : > { %p1184_p13 = scmp.lt.u32.totalorder %s1175_s3, %s1378_s27 }
  0x1b   : > { %p1179_p6 = pneg %p1178_p5  ;;  %p1183_p10 = por %p1182_p7, %p1181_p4 }
  0x1d   : > { %p1185_p12 = por %p1184_p13, %p1183_p10 }
  0x1f   : > { %p1186_p1 = pnand %p1185_p12, %p1179_p6 }
  0x21   : > { %1189 = shalt.err (!%p1186_p1)
}
  0x22   : > { %s1190_s16 = scalar_lea.vmem %s1380_s29, 1024  ;;  %s1289_s17 = smov [#allocation2]  }
  0x23   : > { %p1191_p2 = scmp.ne.s32.totalorder %s1380_s29, %s1190_s16  ;;  %s1195_s22 = sshll.u32 %s1289_s17, 4  ;;  %s1196_s22 = int_to_ptr.vmem [resolvable:$false] %s1195_s22 }
  0x24   : > { %s1197_s23 = scalar_lea.vmem %s1196_s22, 2048  ;;  %p1198_p9 = scmp.lt.s32.totalorder %s1380_s29, %s1196_s22 }
  0x25   : > { %p1193_p5 = pnand %p1191_p2, %p1177_p3  ;;  %p1199_p4 = scmp.lt.s32.totalorder %s1197_s23, %s1190_s16 }
  0x27   : > { %p1194_p11 = pneg %p1193_p5  ;;  %p1200_p7 = por %p1199_p4, %p1198_p9 }
  0x29   : > { %p1201_p10 = pnand %p1200_p7, %p1194_p11 }
  0x2b   : > { %1204 = shalt.err (!%p1201_p10)
}
  0x2c   : > { %s1290_s24 = smov 128   ;;  %s1291_s25 = smov 8  }
  0x2d   : > { %1112 = dma.hbm_to_vmem [thread:$0]  (!%p1384_p0), %s1378_s27, 1024, %s1380_s29, %s1389_s2, %s1290_s24, %s1290_s24, %s1291_s25  }
  0x2e   : > { %p137_p12 = scmp.lt.s32.totalorder %s1287_s11, 3  ;;  %p1601_p1 = scmp.ge.s32.totalorder %s1287_s11, 1 }
  0x30   : > { %p138_p3 = pnand %p1601_p1, %p137_p12 }
  0x31   : > { %s1421_s26 = sand.u32 (!%p138_p3), 1, %s1271_s7  }
  0x32   : > { %141 = sbr.rel (%p138_p3) target bundleno = 477 (0x1dd), region = 24  ;;  %s918_s28 = sshll.u32 (!%p138_p3), %s1421_s26, 6 }
  0x33   : > { %s144_s3 = scalar_lea.sflag (!%p138_p3), [#allocation3], %s1421_s26  ;;  %s1425_s4 = scalar_lea.vmem (!%p138_p3), [#allocation2], %s918_s28 }
  0x39   : > { %1258 = dma.done.wait (%p1356_p8), %s144_s3, 1024  }
  0x3a   : > { %1260 = vsyncadd (%p1356_p8), %s144_s3, 4294966272  ;;  %v169_v0 = vlaneseq  ;;  %v1292_v1 = vmov 0.0   ;;  %vm1293_vm0 = vmmov 0   ;;  %v940_v7 = vld [vmem:[%s1425_s4 + $0x20] sm:$0xff]  ;;  %v941_v8 = vld [vmem:[%s1425_s4 + $0x28] sm:$0xff]  ;;  %vm201_vm4 = vcmask 130048  }
  0x3b   : > { %1029 = vmatprep.subr.bf16.mxu1 %v1292_v1  ;;  %1031 = vmatprep.mubr.msk.bf16.mxu1 %vm1293_vm0, %v1292_v1  ;;  %v492_v9 = vpack.c.bf16 %v941_v8, %v940_v7  ;;  %v188_v10 = vld [vmem:[%s1425_s4] sm:$0xff]  ;;  %v189_v11 = vld [vmem:[%s1425_s4 + $0x8] sm:$0xff]  ;;  %v1294_v14 = vmov 1.0|1.0   ;;  %v951_v33 = vld [vmem:[%s1425_s4 + $0x30] sm:$0xff]  ;;  %s919_s18 = sshll.u32 %s1421_s26, 4 }
  0x3c   : > { %v170_v2 = vshrl.u32 %v169_v0, 7  ;;  %v1434_v3 = vand.u32 127, %v169_v0  ;;  %993 = vmatprep.subr.bf16.mxu0 %v1292_v1  ;;  %995 = vmatprep.mubr.msk.bf16.mxu0 %vm1293_vm0, %v1292_v1  ;;  %v190_v13 = vpack.c.bf16 %v189_v11, %v188_v10  ;;  %v952_v34 = vld [vmem:[%s1425_s4 + $0x38] sm:$0xff]  ;;  %v929_v37 = vld [vmem:[%s1425_s4 + $0x10] sm:$0xff]  ;;  %vm486_vm8 = vcmask 261120   ;;  %s1295_s27 = smov 32  }
  0x3d   : > { %v493_v15 = vunpack.c.l.bf16 %v492_v9  ;;  %v494_v16 = vunpack.c.h.bf16 %v492_v9  ;;  %v930_v38 = vld [vmem:[%s1425_s4 + $0x18] sm:$0xff]  ;;  %v640_v40 = vpack.c.bf16 %v952_v34, %v951_v33  ;;  %s165_s29 = scalar_lea.vmem [#allocation5], %s919_s18  ;;  %vm795_vm9 = vcmask 523520   ;;  %s968_s30 = sshll.u32 %s1279_s9, 8 }
  0x3e   : > { %v171_v4 = vadd.s32 8, %v170_v2  ;;  %v174_v5 = vmul.u32 2, %v170_v2  ;;  %v191_v17 = vunpack.c.l.bf16 %v190_v13  ;;  %v192_v18 = vunpack.c.h.bf16 %v190_v13  ;;  %s816_s2 = sshll.u32 %s165_s29, 4  ;;  %s1542_s13 = scalar_lea.hbm %s1594_s1, %s968_s30  ;;  %s1544_s2 = int_to_ptr.vmem [resolvable:$true] %s816_s2 }
  0x3f   : > { %v495_v19 = vsub.f32 %v940_v7, %v493_v15  ;;  %v496_v20 = vsub.f32 %v941_v8, %v494_v16  ;;  %v339_v43 = vpack.c.bf16 %v930_v38, %v929_v37  ;;  %v641_v44 = vunpack.c.l.bf16 %v640_v40  ;;  %s799_s15 = scalar_lea.sflag [#allocation4], %s1421_s26  ;;  %s1205_s16 = scalar_lea.vmem %s1544_s2, 256 }
  0x40   : > { %v175_v6 = vmul.u32 2, %v171_v4  ;;  %vm176_vm1 = vcmp.eq.s32.totalorder %v1434_v3, %v174_v5  ;;  %v193_v21 = vsub.f32 %v188_v10, %v191_v17  ;;  %v194_v22 = vsub.f32 %v189_v11, %v192_v18  ;;  %p1206_p8 = scmp.ne.s32.totalorder %s1544_s2, %s1205_s16  ;;  %p1606_p9 = scmp.ne.s32.totalorder %s1598_s19, 0 }
  0x41   : > { %v497_v23 = vpack.c.bf16 %v496_v20, %v495_v19  ;;  %v181_v29 = vadd.s32 1, %v174_v5  ;;  %v642_v45 = vunpack.c.h.bf16 %v640_v40  ;;  %v340_v46 = vunpack.c.l.bf16 %v339_v43  ;;  %s1296_s9 = smov [#allocation5]  }
  0x42   : > { %vm177_vm2 = vcmp.eq.s32.totalorder %v1434_v3, %v175_v6  ;;  %v195_v24 = vpack.c.bf16 %v194_v22, %v193_v21  ;;  %v182_v30 = vadd.s32 1, %v175_v6  ;;  %v341_v47 = vunpack.c.h.bf16 %v339_v43  ;;  %p1207_p11 = pnand %p1206_p8, %p1606_p9  ;;  %s1209_s17 = sshll.u32 %s1296_s9, 4  ;;  %s1210_s17 = int_to_ptr.vmem [resolvable:$false] %s1209_s17 }
  0x43   : > { %vm1445_vm3 = vmpackc.low %vm177_vm2, %vm176_vm1  ;;  %v498_v25 = vunpack.c.l.bf16 %v497_v23  ;;  %v499_v26 = vunpack.c.h.bf16 %v497_v23  ;;  %vm183_vm5 = vcmp.eq.s32.totalorder %v1434_v3, %v181_v29  ;;  %v643_v48 = vsub.f32 %v951_v33, %v641_v44  ;;  %s1211_s22 = scalar_lea.vmem %s1210_s17, 512  ;;  %p1212_p6 = scmp.lt.s32.totalorder %s1544_s2, %s1210_s17 }
  0x44   : > { %1030 = vmatpush3.bf16.msk.msra.mxu1 %vm1445_vm3, %v1294_v14  ;;  %994 = vmatpush3.bf16.msk.msra.mxu0 %vm1445_vm3, %v1294_v14  ;;  %v196_v27 = vunpack.c.l.bf16 %v195_v24  ;;  %v197_v28 = vunpack.c.h.bf16 %v195_v24  ;;  %vm184_vm6 = vcmp.eq.s32.totalorder %v1434_v3, %v182_v30  ;;  %v644_v49 = vsub.f32 %v952_v34, %v642_v45  ;;  %p1208_p0 = pneg %p1207_p11  ;;  %p1213_p13 = scmp.lt.s32.totalorder %s1211_s22, %s1205_s16 }
  0x45   : > { %1035 = vmatprep.subr.bf16.mxu1 %v1292_v1  ;;  %999 = vmatprep.subr.bf16.mxu0 %v1292_v1  ;;  %v500_v31 = vsub.f32 %v495_v19, %v498_v25  ;;  %v501_v32 = vsub.f32 %v496_v20, %v499_v26  ;;  %vm1491_vm7 = vmpackc.low %vm184_vm6, %vm183_vm5  ;;  %v342_v50 = vsub.f32 %v929_v37, %v340_v46 }
  0x46   : > { %v198_v35 = vsub.f32 %v193_v21, %v196_v27  ;;  %v199_v36 = vsub.f32 %v194_v22, %v197_v28  ;;  %v343_v51 = vsub.f32 %v930_v38, %v341_v47  ;;  %v645_v52 = vpack.c.bf16 %v644_v49, %v643_v48  ;;  %p1214_p2 = por %p1213_p13, %p1212_p6 }
  0x47   : > { %1032 = vmatmul.mubr.msk.bf16.vlgmr.msra.gmra.mrb[0].mxu1 %vm201_vm4, %v497_v23  ;;  %996 = vmatmul.mubr.msk.bf16.vlgmr.msra.gmra.mrb[0].mxu0 %vm201_vm4, %v195_v24  ;;  %v502_v39 = vpack.c.bf16 %v501_v32, %v500_v31 }
  0x48   : > { %1036 = vmatpush3.bf16.msk.msra.mxu1 %vm1445_vm3, %v1294_v14  ;;  %1037 = vmatprep.mubr.msk.bf16.mxu1 %vm1293_vm0, %v1292_v1  ;;  %v200_v42 = vpack.c.bf16 %v199_v36, %v198_v35  ;;  %v344_v53 = vpack.c.bf16 %v343_v51, %v342_v50  ;;  %v646_v54 = vunpack.c.l.bf16 %v645_v52  ;;  %v647_v55 = vunpack.c.h.bf16 %v645_v52  ;;  %p1215_p5 = pnand %p1214_p2, %p1208_p0 }
  0x49   : > { %1041 = vmatprep.subr.bf16.mxu1 %v1292_v1  ;;  %1000 = vmatpush3.bf16.msk.msra.mxu0 %vm1445_vm3, %v1294_v14 }
  0x4a   : > { %1001 = vmatprep.mubr.msk.bf16.mxu0 %vm1293_vm0, %v1292_v1  ;;  %1005 = vmatprep.subr.bf16.mxu0 %v1292_v1  ;;  %v345_v56 = vunpack.c.l.bf16 %v344_v53  ;;  %v346_v57 = vunpack.c.h.bf16 %v344_v53  ;;  %v648_v58 = vsub.f32 %v643_v48, %v646_v54  ;;  %v649_v59 = vsub.f32 %v644_v49, %v647_v55 }
  0x4c   : > { %v347_v60 = vsub.f32 %v342_v50, %v345_v56  ;;  %v348_v61 = vsub.f32 %v343_v51, %v346_v57  ;;  %v650_v62 = vpack.c.bf16 %v649_v59, %v648_v58 }
  0x4e   : > { %v349_v63 = vpack.c.bf16 %v348_v61, %v347_v60 }
  0x53   : > { %1038 = vmatmul.mubr.msk.bf16.vlgmr.msra.gmra.mrb[0].mxu1 %vm201_vm4, %v492_v9  ;;  %1002 = vmatmul.mubr.msk.bf16.vlgmr.msra.gmra.mrb[0].mxu0 %vm201_vm4, %v190_v13 }
  0x54   : > { %1042 = vmatpush3.bf16.msk.msra.mxu1 %vm1445_vm3, %v1294_v14  ;;  %1043 = vmatprep.mubr.msk.bf16.mxu1 %vm1293_vm0, %v1292_v1 }
  0x55   : > { %1047 = vmatprep.subr.bf16.mxu1 %v1292_v1  ;;  %1006 = vmatpush3.bf16.msk.msra.mxu0 %vm1445_vm3, %v1294_v14 }
  0x56   : > { %1007 = vmatprep.mubr.msk.bf16.mxu0 %vm1293_vm0, %v1292_v1  ;;  %1011 = vmatprep.subr.bf16.mxu0 %v1292_v1 }
  0x5f   : > { %1044 = vmatmul.mubr.msk.bf16.vlgmr.msra.gmra.mrb[0].mxu1 %vm201_vm4, %v502_v39  ;;  %1008 = vmatmul.mubr.msk.bf16.vlgmr.msra.gmra.mrb[0].mxu0 %vm201_vm4, %v200_v42 }
  0x60   : > { %1048 = vmatpush3.bf16.msk.msra.mxu1 %vm1491_vm7, %v1294_v14  ;;  %1049 = vmatprep.mubr.msk.bf16.mxu1 %vm1293_vm0, %v1292_v1 }
  0x61   : > { %1053 = vmatprep.subr.bf16.mxu1 %v1292_v1  ;;  %1012 = vmatpush3.bf16.msk.msra.mxu0 %vm1491_vm7, %v1294_v14 }
  0x62   : > { %1013 = vmatprep.mubr.msk.bf16.mxu0 %vm1293_vm0, %v1292_v1  ;;  %1017 = vmatprep.subr.bf16.mxu0 %v1292_v1 }
  0x6b   : > { %1050 = vmatmul.mubr.msk.bf16.vlgmr.msra.gmra.mrb[0].mxu1 %vm201_vm4, %v645_v52  ;;  %1014 = vmatmul.mubr.msk.bf16.vlgmr.msra.gmra.mrb[0].mxu0 %vm201_vm4, %v344_v53 }
  0x6c   : > { %1054 = vmatpush3.bf16.msk.msra.mxu1 %vm1491_vm7, %v1294_v14  ;;  %1055 = vmatprep.mubr.msk.bf16.mxu1 %vm1293_vm0, %v1292_v1 }
  0x6d   : > { %1059 = vmatprep.subr.bf16.mxu1 %v1292_v1  ;;  %1018 = vmatpush3.bf16.msk.msra.mxu0 %vm1491_vm7, %v1294_v14 }
  0x6e   : > { %1019 = vmatprep.mubr.msk.bf16.mxu0 %vm1293_vm0, %v1292_v1  ;;  %1023 = vmatprep.subr.bf16.mxu0 %v1292_v1 }
  0x77   : > { %1056 = vmatmul.mubr.msk.bf16.vlgmr.msra.gmra.mrb[0].mxu1 %vm201_vm4, %v640_v40  ;;  %1020 = vmatmul.mubr.msk.bf16.vlgmr.msra.gmra.mrb[0].mxu0 %vm201_vm4, %v339_v43 }
  0x78   : > { %1060 = vmatpush3.bf16.msk.msra.mxu1 %vm1491_vm7, %v1294_v14  ;;  %1061 = vmatprep.mubr.msk.bf16.mxu1 %vm1293_vm0, %v1292_v1 }
  0x79   : > { %1024 = vmatpush3.bf16.msk.msra.mxu0 %vm1491_vm7, %v1294_v14  ;;  %1025 = vmatprep.mubr.msk.bf16.mxu0 %vm1293_vm0, %v1292_v1 }
  0x83   : > { %1062 = vmatmul.mubr.msk.bf16.vlgmr.msra.gmra.mrb[0].mxu1 %vm201_vm4, %v650_v62  ;;  %1026 = vmatmul.mubr.msk.bf16.vlgmr.msra.gmra.mrb[0].mxu0 %vm201_vm4, %v349_v63 }
 0x156   : > { %v776_v0 = vpop.f32.mrb[0].mxu1  ;;  %v475_v4 = vpop.f32.mrb[0].mxu0 }
 0x157   : > { %789 = vrot.lane.b32.xlu0 %v776_v0, %s1295_s27  ;;  %v1063_v2 = vpop.f32.mrb[1].mxu1  ;;  %487 = vst.msk [vmem:[%s165_s29] sm:$0xff] %vm486_vm8, %v475_v4  ;;  %v1027_v5 = vpop.f32.mrb[1].mxu0 }
 0x158   : > { %v779_v3 = vpop.f32.mrb[2].mxu1  ;;  %v478_v6 = vpop.f32.mrb[2].mxu0 }
 0x159   : > { %v1064_v1 = vpop.f32.mrb[3].mxu1  ;;  %488 = vst.msk [vmem:[%s165_s29 + $0x8] sm:$0xff] %vm486_vm8, %v478_v6  ;;  %v1028_v7 = vpop.f32.mrb[3].mxu0 }
 0x15b   : > { %791 = vrot.lane.b32.xlu0 %v779_v3, %s1295_s27 }
 0x1c9   : > { %v790_v8 = vpop.permute.xlu0 %789 }
 0x1ca   : > { %796 = vst.msk [vmem:[%s165_s29] sm:$0xff] %vm795_vm9, %v790_v8 }
 0x1cd   : > { %v792_v9 = vpop.permute.xlu0 %791 }
 0x1ce   : > { %797 = vst.msk [vmem:[%s165_s29 + $0x8] sm:$0xff] %vm795_vm9, %v792_v9 }
 0x1cf   : > { %1218 = shalt.err (!%p1215_p5)
}
 0x1d0   : > { %s1219_s23 = scalar_lea.hbm %s1542_s13, 256  ;;  %s1223_s28 = scalar_lea.hbm %s1594_s1, 512 }
 0x1d1   : > { %p1220_p4 = scmp.ne.s32.totalorder %s1542_s13, %s1219_s23  ;;  %p1224_p12 = scmp.lt.u32.totalorder %s1542_s13, %s1594_s1 }
 0x1d2   : > { %p1225_p1 = scmp.lt.u32.totalorder %s1223_s28, %s1219_s23  ;;  %p1227_p8 = scmp.lt.u32.totalorder %s1219_s23, %s1542_s13 }
 0x1d3   : > { %p1221_p7 = pnand %p1220_p4, %p1606_p9 }
 0x1d4   : > { %p1226_p3 = por %p1225_p1, %p1224_p12 }
 0x1d5   : > { %p1222_p10 = pneg %p1221_p7 }
 0x1d6   : > { %p1228_p11 = por %p1227_p8, %p1226_p3 }
 0x1d8   : > { %p1229_p0 = pnand %p1228_p11, %p1222_p10 }
 0x1da   : > { %1232 = shalt.err (!%p1229_p0)
}
 0x1db   : > { %s1297_s18 = smov 128   ;;  %s1298_s27 = smov 8  }
 0x1dc   : > { %1107 = dma.vmem_to_hbm [thread:$0]  (%p1606_p9), %s1544_s2, 256, %s1542_s13, %s799_s15, %s1297_s18, %s1297_s18, %s1298_s27  }
 0x1dd PF: > { %s831_s29 = sand.u32 1, %s1267_s6   ;;  %p1607_p6 = scmp.ne.s32.totalorder %s1599_s21, 0 }
 0x1de   : > { %p1608_p13 = scmp.ge.s32.totalorder %s1287_s11, 2  ;;  %s832_s30 = scalar_lea.sflag [#allocation4], %s831_s29 }
 0x1e0   : > { %p1114_p2 = pnand %p1608_p13, %p1607_p6 }
 0x1e2   : > { %1262 = dma.done.wait (!%p1114_p2), %s832_s30, 256  }
 0x1e3   : > { %1264 = vsyncadd (!%p1114_p2), %s832_s30, 4294967040  ;;  %s17_s11 = sadd.s32 1, %s1287_s11   ;;  %s1609_s6 = smov %s1271_s7 }
 0x1e4   : > { %p14_p5 = scmp.ge.s32.totalorder %s17_s11, 4   ;;  %s1610_s7 = smov %s1275_s8 }
 0x1e5   : > { %s1611_s8 = smov %s1365_s20  ;;  %s1612_s9 = smov %s1283_s10 }
 0x1e6   : > { %s1613_s10 = smov %s1615_s14  ;;  %16 = sbr.rel (!%p14_p5) target bundleno = 6 (0x6), region = 72 }
 0x1ed   :  { %837 = vsyncpa [#allocation3], 1 }
 0x1ee   :  { %839 = vsyncpa [#allocation3 + $0x1], 1 }
 0x1ef   :  { %840 = vsyncpa [#allocation4], 1 }
 0x1f0   :  { %842 = vsyncpa [#allocation4 + $0x1], 1 }

</bundles_post_ra>
